<compile_context>
chip_gen: v7x
topology: tpu7x:2x2x1
jax: 0.10.0
libtpu: 0.0.40
codegen_flags: <defaults>
</compile_context>

<pallas_src>
import functools

import jax
import jax.numpy as jnp
from jax.experimental import pallas as pl
from jax.experimental.pallas import tpu as pltpu

IGNORE_LABEL = -1  # module default (configer path not exercised here)


def _round_up(x, m):
    return ((x + m - 1) // m) * m


def _bpc_kernel(logits_ref, labels_ref, sum_out_ref, cnt_out_ref,
                sum_acc, cnt_acc, *,
                ignore_label, num_channels, lanes_total, tl, num_j, num_jp):
    """One (C, G, TL) channel-major, sublane-packed tile of one batch row.

    logits_ref : (C, G, TL) native dtype (cast to f32 in-kernel)
    labels_ref : (G, TL)    int32
    sum_out_ref: (1, 1)     f32 per-(n,p) loss sum   (written at last jp)
    cnt_out_ref: (1, 1)     f32 per-(n,p) valid count(written at last jp)
    sum_acc    : (G, TL)    f32 VMEM scratch, per-lane running loss sum
    cnt_acc    : (G, TL)    f32 VMEM scratch, per-lane running valid count
    """
    p = pl.program_id(1)
    jp = pl.program_id(2)
    j = p * num_jp + jp                          # global lane-tile index

    @pl.when(jp == 0)
    def _init():
        sum_acc[...] = jnp.zeros_like(sum_acc)
        cnt_acc[...] = jnp.zeros_like(cnt_acc)

    labels = labels_ref[...]                     # (G, TL) int32

    # Numerically stable log-softmax over channels, unrolled so every op runs
    # on a dense (G, TL) slab (full sublane occupancy, pure VALU + EUP).
    m = logits_ref[0].astype(jnp.float32)
    for c in range(1, num_channels):
        m = jnp.maximum(m, logits_ref[c].astype(jnp.float32))

    sh = logits_ref[0].astype(jnp.float32) - m
    sumexp = jnp.exp(sh)
    tgt = jnp.where(labels == 0, sh, 0.0)
    for c in range(1, num_channels):
        sh = logits_ref[c].astype(jnp.float32) - m
        sumexp = sumexp + jnp.exp(sh)
        tgt = jnp.where(labels == c, sh, tgt)

    loss = jnp.log(sumexp) - tgt                 # (G, TL) per-pixel NLL
    base_valid = labels != ignore_label

    def _accumulate(valid):
        # Keep jnp.where (NOT arithmetic masking): garbage logits in the
        # ragged tail may be inf/NaN and must not leak into the accumulators.
        sum_acc[...] += jnp.where(valid, loss, 0.0)
        cnt_acc[...] += valid.astype(jnp.float32)

    if lanes_total % tl != 0:
        # Only the globally-last lane tile is partial; full tiles skip the
        # iota/compare bounds mask entirely.
        last = num_j - 1

        @pl.when(j != last)
        def _full_tile():
            _accumulate(base_valid)

        @pl.when(j == last)
        def _partial_tile():
            lane = jax.lax.broadcasted_iota(jnp.int32, labels.shape, 1)
            _accumulate(base_valid & ((j * tl + lane) < lanes_total))
    else:
        _accumulate(base_valid)

    @pl.when(jp == num_jp - 1)
    def _finalize():
        # Reduce per-lane partials to two scalars; happens once per (n, p).
        s_row = jnp.sum(sum_acc[...], axis=1, keepdims=True)      # (G, 1)
        c_row = jnp.sum(cnt_acc[...], axis=1, keepdims=True)      # (G, 1)
        sum_out_ref[...] = jnp.sum(s_row, axis=0, keepdims=True)  # (1, 1)
        cnt_out_ref[...] = jnp.sum(c_row, axis=0, keepdims=True)  # (1, 1)


def bpc_loss(boundary_logits, boundary_target, *, ignore_label=IGNORE_LABEL,
             max_lanes_per_step=None, vmem_budget_bytes=32 * 1024 * 1024):
    """Cross-entropy with ignore_index, mean over valid pixels.

    boundary_logits: (N, C, H, W) float (f32 or bf16; DMA'd in native dtype)
    boundary_target: (N, H, W)    int
    returns: scalar float32 loss
    """
    N, C, H, W = boundary_logits.shape
    HW = H * W
    in_bytes = jnp.dtype(boundary_logits.dtype).itemsize

    # Pack spatial pixels into (G, L): free contiguous reshapes. G=8 fills the
    # f32 sublane dimension so every VPU op runs on dense vregs.
    G = 1
    for g in (8, 4, 2):
        if HW % g == 0:
            G = g
            break
    L = HW // G

    x = boundary_logits.reshape(N, C, G, L)
    # TODO(synk): if targets arrive upstream as int8/uint8, DMA them natively
    # and cast in-kernel to cut label HBM traffic 4x; here we take them as-is.
    t = boundary_target.reshape(N, G, L).astype(jnp.int32)

    # Lane tile from the VMEM budget: double-buffered logits + labels blocks,
    # the two resident f32 accumulators, and ~8 live f32 temporaries per lane.
    bytes_per_lane = G * (2 * C * in_bytes + 2 * 4 + 2 * 4 + 8 * 4)
    tl = max(128, (vmem_budget_bytes // bytes_per_lane) // 128 * 128)
    if max_lanes_per_step is not None:
        tl = min(tl, _round_up(max_lanes_per_step, 128))
    tl = min(tl, _round_up(L, 128))

    num_j = (L + tl - 1) // tl                 # global number of lane tiles
    # Second "parallel" axis so both v7x TensorCores stay busy when N is odd
    # (no-op on v5e/v6e: 1 TC/chip). Only used when the split is exact.
    P = 2 if (N % 2 == 1 and num_j >= 2 and num_j % 2 == 0) else 1
    num_jp = num_j // P

    kernel = functools.partial(
        _bpc_kernel, ignore_label=ignore_label, num_channels=C,
        lanes_total=L, tl=tl, num_j=num_j, num_jp=num_jp)

    cost = pl.CostEstimate(
        flops=int(N * HW * (6 * C + 8)),
        transcendentals=int(N * HW * (C + 1)),
        bytes_accessed=int(N * C * HW * in_bytes + N * HW * 4 + 8 * N * P),
    )

    vmem_limit = int(min(max(vmem_budget_bytes + (8 << 20), 32 << 20), 48 << 20))

    sums, cnts = pl.pallas_call(
        kernel,
        out_shape=(jax.ShapeDtypeStruct((N * P, 1, 1), jnp.float32),
                   jax.ShapeDtypeStruct((N * P, 1, 1), jnp.float32)),
        grid_spec=pltpu.PrefetchScalarGridSpec(
            num_scalar_prefetch=0,
            grid=(N, P, num_jp),
            in_specs=[
                # (C, G, TL) channel-major logits tile (batch dim squeezed).
                pl.BlockSpec((None, C, G, tl),
                             lambda n, p, jp: (n, 0, 0, p * num_jp + jp)),
                # (G, TL) labels tile.
                pl.BlockSpec((None, G, tl),
                             lambda n, p, jp: (n, 0, p * num_jp + jp)),
            ],
            out_specs=[
                # Per-(n,p) scalar partials; same block across jp -> resident.
                pl.BlockSpec((None, 1, 1), lambda n, p, jp: (n * P + p, 0, 0)),
                pl.BlockSpec((None, 1, 1), lambda n, p, jp: (n * P + p, 0, 0)),
            ],
            scratch_shapes=[pltpu.VMEM((G, tl), jnp.float32),
                            pltpu.VMEM((G, tl), jnp.float32)],
        ),
        compiler_params=pltpu.CompilerParams(
            dimension_semantics=("parallel", "parallel", "arbitrary"),
            vmem_limit_bytes=vmem_limit),
        cost_estimate=cost,
    )(x, t)

    # Tiny final reduction + divide (matches F.cross_entropy mean-over-valid;
    # all-ignored input yields 0/0 = NaN, same as PyTorch).
    return jnp.sum(sums) / jnp.sum(cnts)


def _reference(boundary_logits, boundary_target, ignore_label=IGNORE_LABEL):
    """Pure-JAX reference mirroring F.cross_entropy(..., ignore_index=...)."""
    N, C, H, W = boundary_logits.shape
    x = jnp.transpose(boundary_logits, (0, 2, 3, 1)).reshape(-1, C)
    t = boundary_target.reshape(-1)
    logp = jax.nn.log_softmax(x.astype(jnp.float32), axis=-1)
    safe_t = jnp.where(t == ignore_label, 0, t)
    nll = -jnp.take_along_axis(logp, safe_t[:, None], axis=-1)[:, 0]
    valid = (t != ignore_label).astype(jnp.float32)
    return jnp.sum(nll * valid) / jnp.sum(valid)


if __name__ == "__main__":
    key = jax.random.PRNGKey(0)

    def make_inputs(k, n, c, h, w, dtype):
        k1, k2, k3 = jax.random.split(k, 3)
        logits = jax.random.normal(k1, (n, c, h, w), dtype=jnp.float32).astype(dtype)
        target = jax.random.randint(k2, (n, h, w), 0, c, dtype=jnp.int32)
        ignore = jax.random.bernoulli(k3, 0.1, (n, h, w))
        target = jnp.where(ignore, IGNORE_LABEL, target)
        return logits, target

    k0, k1, k2 = jax.random.split(key, 3)

    # Main case (module-scale shapes): N=2, C=4, 16x16 — single (partial) tile.
    logits, target = make_inputs(k0, 2, 4, 16, 16, jnp.float32)
    loss = jax.block_until_ready(bpc_loss(logits, target))
    ref = _reference(logits, target)
    assert jnp.allclose(loss, ref, atol=1e-5, rtol=1e-5), (loss, ref)

    # Multi-tile, even spatial split: exercises the P=2 (megacore) path, bf16.
    logits, target = make_inputs(k1, 1, 2, 64, 64, jnp.bfloat16)
    loss = jax.block_until_ready(bpc_loss(logits, target, max_lanes_per_step=128))
    ref = _reference(logits, target)
    assert jnp.allclose(loss, ref, atol=1e-4, rtol=1e-4), (loss, ref)

    # Multi-tile with a ragged last tile (masked-tail path on the last j only).
    logits, target = make_inputs(k2, 1, 3, 48, 48, jnp.float32)
    loss = jax.block_until_ready(bpc_loss(logits, target, max_lanes_per_step=128))
    ref = _reference(logits, target)
    assert jnp.allclose(loss, ref, atol=1e-5, rtol=1e-5), (loss, ref)

    print("KERNEL_OK")
</pallas_src>

<mosaic_0001>
module attributes {stable_mosaic.version = 11 : i64} {
  func.func @_bpc_kernel(%arg0: i32, %arg1: i32, %arg2: i32, %arg3: memref<1x4x8x128xf32, #tpu.memory_space<vmem>>, %arg4: memref<1x8x128xi32, #tpu.memory_space<vmem>>, %arg5: memref<1x1x1xf32, #tpu.memory_space<vmem>>, %arg6: memref<1x1x1xf32, #tpu.memory_space<vmem>>, %arg7: memref<8x128xf32, #tpu.memory_space<vmem>>, %arg8: memref<8x128xf32, #tpu.memory_space<vmem>>) attributes {dimension_semantics = [#tpu.dimension_semantics<parallel>, #tpu.dimension_semantics<parallel>, #tpu.dimension_semantics<arbitrary>], iteration_bounds = array<i64: 2, 1, 1>, scalar_prefetch = 0 : i64, scratch_operands = 2 : i64, tpu.core_type = #tpu.core_type<tc>, window_params = [{transform_indices = @transform_0, window_bounds = array<i64: 1, 4, 8, 128>}, {transform_indices = @transform_1, window_bounds = array<i64: 1, 8, 128>}, {transform_indices = @transform_2, window_bounds = array<i64: 1, 1, 1>}, {transform_indices = @transform_3, window_bounds = array<i64: 1, 1, 1>}]} {
    %c1_i32 = arith.constant 1 : i32
    %0 = arith.muli %arg1, %c1_i32 : i32
    %1 = arith.addi %0, %arg2 : i32
    %c0_i32 = arith.constant 0 : i32
    %2 = arith.cmpi eq, %arg2, %c0_i32 : i32
    %3 = arith.extui %2 : i1 to i32
    %c0_i32_0 = arith.constant 0 : i32
    %4 = arith.cmpi ne, %3, %c0_i32_0 : i32
    scf.if %4 {
      %cst_40 = arith.constant 0.000000e+00 : f32
      %63 = vector.broadcast %cst_40 : f32 to vector<8x128xf32>
      %c0_41 = arith.constant 0 : index
      %c0_42 = arith.constant 0 : index
      %64 = vector.load %arg7[%c0_41, %c0_42] : memref<8x128xf32, #tpu.memory_space<vmem>>, vector<8x128xf32>
      tpu.vector_store %arg7[%c0_41, %c0_42], %63 {strides = array<i32>} : memref<8x128xf32, #tpu.memory_space<vmem>>, vector<8x128xf32>,
      %cst_43 = arith.constant 0.000000e+00 : f32
      %65 = vector.broadcast %cst_43 : f32 to vector<8x128xf32>
      %c0_44 = arith.constant 0 : index
      %c0_45 = arith.constant 0 : index
      %66 = vector.load %arg8[%c0_44, %c0_45] : memref<8x128xf32, #tpu.memory_space<vmem>>, vector<8x128xf32>
      tpu.vector_store %arg8[%c0_44, %c0_45], %65 {strides = array<i32>} : memref<8x128xf32, #tpu.memory_space<vmem>>, vector<8x128xf32>,
    } else {
    }
    %c0 = arith.constant 0 : index
    %c0_1 = arith.constant 0 : index
    %c0_2 = arith.constant 0 : index
    %5 = vector.load %arg4[%c0, %c0_1, %c0_2] : memref<1x8x128xi32, #tpu.memory_space<vmem>>, vector<1x8x128xi32>
    %6 = vector.shape_cast %5 : vector<1x8x128xi32> to vector<8x128xi32>
    %c0_3 = arith.constant 0 : index
    %c0_4 = arith.constant 0 : index
    %c0_5 = arith.constant 0 : index
    %c0_6 = arith.constant 0 : index
    %7 = vector.load %arg3[%c0_3, %c0_4, %c0_5, %c0_6] : memref<1x4x8x128xf32, #tpu.memory_space<vmem>>, vector<1x1x8x128xf32>
    %8 = vector.shape_cast %7 : vector<1x1x8x128xf32> to vector<8x128xf32>
    %c0_7 = arith.constant 0 : index
    %c1 = arith.constant 1 : index
    %c0_8 = arith.constant 0 : index
    %c0_9 = arith.constant 0 : index
    %9 = vector.load %arg3[%c0_7, %c1, %c0_8, %c0_9] : memref<1x4x8x128xf32, #tpu.memory_space<vmem>>, vector<1x1x8x128xf32>
    %10 = vector.shape_cast %9 : vector<1x1x8x128xf32> to vector<8x128xf32>
    %11 = arith.maximumf %8, %10 : vector<8x128xf32>
    %c0_10 = arith.constant 0 : index
    %c2 = arith.constant 2 : index
    %c0_11 = arith.constant 0 : index
    %c0_12 = arith.constant 0 : index
    %12 = vector.load %arg3[%c0_10, %c2, %c0_11, %c0_12] : memref<1x4x8x128xf32, #tpu.memory_space<vmem>>, vector<1x1x8x128xf32>
    %13 = vector.shape_cast %12 : vector<1x1x8x128xf32> to vector<8x128xf32>
    %14 = arith.maximumf %11, %13 : vector<8x128xf32>
    %c0_13 = arith.constant 0 : index
    %c3 = arith.constant 3 : index
    %c0_14 = arith.constant 0 : index
    %c0_15 = arith.constant 0 : index
    %15 = vector.load %arg3[%c0_13, %c3, %c0_14, %c0_15] : memref<1x4x8x128xf32, #tpu.memory_space<vmem>>, vector<1x1x8x128xf32>
    %16 = vector.shape_cast %15 : vector<1x1x8x128xf32> to vector<8x128xf32>
    %17 = arith.maximumf %14, %16 : vector<8x128xf32>
    %c0_16 = arith.constant 0 : index
    %c0_17 = arith.constant 0 : index
    %c0_18 = arith.constant 0 : index
    %c0_19 = arith.constant 0 : index
    %18 = vector.load %arg3[%c0_16, %c0_17, %c0_18, %c0_19] : memref<1x4x8x128xf32, #tpu.memory_space<vmem>>, vector<1x1x8x128xf32>
    %19 = vector.shape_cast %18 : vector<1x1x8x128xf32> to vector<8x128xf32>
    %20 = arith.subf %19, %17 : vector<8x128xf32>
    %21 = math.exp %20 : vector<8x128xf32>
    %c0_i32_20 = arith.constant 0 : i32
    %22 = vector.broadcast %c0_i32_20 : i32 to vector<8x128xi32>
    %23 = arith.cmpi eq, %6, %22 : vector<8x128xi32>
    %cst = arith.constant 0.000000e+00 : f32
    %24 = vector.broadcast %cst : f32 to vector<8x128xf32>
    %25 = arith.select %23, %20, %24 : vector<8x128xi1>, vector<8x128xf32>
    %c0_21 = arith.constant 0 : index
    %c1_22 = arith.constant 1 : index
    %c0_23 = arith.constant 0 : index
    %c0_24 = arith.constant 0 : index
    %26 = vector.load %arg3[%c0_21, %c1_22, %c0_23, %c0_24] : memref<1x4x8x128xf32, #tpu.memory_space<vmem>>, vector<1x1x8x128xf32>
    %27 = vector.shape_cast %26 : vector<1x1x8x128xf32> to vector<8x128xf32>
    %28 = arith.subf %27, %17 : vector<8x128xf32>
    %29 = math.exp %28 : vector<8x128xf32>
    %30 = arith.addf %21, %29 : vector<8x128xf32>
    %c1_i32_25 = arith.constant 1 : i32
    %31 = vector.broadcast %c1_i32_25 : i32 to vector<8x128xi32>
    %32 = arith.cmpi eq, %6, %31 : vector<8x128xi32>
    %33 = arith.select %32, %28, %25 : vector<8x128xi1>, vector<8x128xf32>
    %c0_26 = arith.constant 0 : index
    %c2_27 = arith.constant 2 : index
    %c0_28 = arith.constant 0 : index
    %c0_29 = arith.constant 0 : index
    %34 = vector.load %arg3[%c0_26, %c2_27, %c0_28, %c0_29] : memref<1x4x8x128xf32, #tpu.memory_space<vmem>>, vector<1x1x8x128xf32>
    %35 = vector.shape_cast %34 : vector<1x1x8x128xf32> to vector<8x128xf32>
    %36 = arith.subf %35, %17 : vector<8x128xf32>
    %37 = math.exp %36 : vector<8x128xf32>
    %38 = arith.addf %30, %37 : vector<8x128xf32>
    %c2_i32 = arith.constant 2 : i32
    %39 = vector.broadcast %c2_i32 : i32 to vector<8x128xi32>
    %40 = arith.cmpi eq, %6, %39 : vector<8x128xi32>
    %41 = arith.select %40, %36, %33 : vector<8x128xi1>, vector<8x128xf32>
    %c0_30 = arith.constant 0 : index
    %c3_31 = arith.constant 3 : index
    %c0_32 = arith.constant 0 : index
    %c0_33 = arith.constant 0 : index
    %42 = vector.load %arg3[%c0_30, %c3_31, %c0_32, %c0_33] : memref<1x4x8x128xf32, #tpu.memory_space<vmem>>, vector<1x1x8x128xf32>
    %43 = vector.shape_cast %42 : vector<1x1x8x128xf32> to vector<8x128xf32>
    %44 = arith.subf %43, %17 : vector<8x128xf32>
    %45 = math.exp %44 : vector<8x128xf32>
    %46 = arith.addf %38, %45 : vector<8x128xf32>
    %c3_i32 = arith.constant 3 : i32
    %47 = vector.broadcast %c3_i32 : i32 to vector<8x128xi32>
    %48 = arith.cmpi eq, %6, %47 : vector<8x128xi32>
    %49 = arith.select %48, %44, %41 : vector<8x128xi1>, vector<8x128xf32>
    %50 = math.log %46 : vector<8x128xf32>
    %51 = arith.subf %50, %49 : vector<8x128xf32>
    %c-1_i32 = arith.constant -1 : i32
    %52 = vector.broadcast %c-1_i32 : i32 to vector<8x128xi32>
    %53 = arith.cmpi ne, %6, %52 : vector<8x128xi32>
    %c0_i32_34 = arith.constant 0 : i32
    %54 = arith.cmpi ne, %1, %c0_i32_34 : i32
    %55 = arith.extui %54 : i1 to i32
    %c0_i32_35 = arith.constant 0 : i32
    %56 = arith.cmpi ne, %55, %c0_i32_35 : i32
    scf.if %56 {
      %c0_40 = arith.constant 0 : index
      %c0_41 = arith.constant 0 : index
      %63 = vector.load %arg7[%c0_40, %c0_41] : memref<8x128xf32, #tpu.memory_space<vmem>>, vector<8x128xf32>
      %cst_42 = arith.constant 0.000000e+00 : f32
      %64 = vector.broadcast %cst_42 : f32 to vector<8x128xf32>
      %65 = arith.select %53, %51, %64 : vector<8x128xi1>, vector<8x128xf32>
      %66 = arith.addf %63, %65 : vector<8x128xf32>
      %c0_43 = arith.constant 0 : index
      %c0_44 = arith.constant 0 : index
      %67 = vector.load %arg7[%c0_43, %c0_44] : memref<8x128xf32, #tpu.memory_space<vmem>>, vector<8x128xf32>
      tpu.vector_store %arg7[%c0_43, %c0_44], %66 {strides = array<i32>} : memref<8x128xf32, #tpu.memory_space<vmem>>, vector<8x128xf32>,
      %c0_45 = arith.constant 0 : index
      %c0_46 = arith.constant 0 : index
      %68 = vector.load %arg8[%c0_45, %c0_46] : memref<8x128xf32, #tpu.memory_space<vmem>>, vector<8x128xf32>
      %69 = arith.extui %53 : vector<8x128xi1> to vector<8x128xi32>
      %70 = arith.sitofp %69 : vector<8x128xi32> to vector<8x128xf32>
      %71 = arith.addf %68, %70 : vector<8x128xf32>
      %c0_47 = arith.constant 0 : index
      %c0_48 = arith.constant 0 : index
      %72 = vector.load %arg8[%c0_47, %c0_48] : memref<8x128xf32, #tpu.memory_space<vmem>>, vector<8x128xf32>
      tpu.vector_store %arg8[%c0_47, %c0_48], %71 {strides = array<i32>} : memref<8x128xf32, #tpu.memory_space<vmem>>, vector<8x128xf32>,
    } else {
    }
    %c0_i32_36 = arith.constant 0 : i32
    %57 = arith.cmpi eq, %1, %c0_i32_36 : i32
    %58 = arith.extui %57 : i1 to i32
    %c0_i32_37 = arith.constant 0 : i32
    %59 = arith.cmpi ne, %58, %c0_i32_37 : i32
    scf.if %59 {
      %63 = tpu.iota {dimensions = array<i32: 1>} : vector<8x128xi32>
      %c128_i32 = arith.constant 128 : i32
      %64 = arith.muli %1, %c128_i32 : i32
      %65 = vector.broadcast %64 : i32 to vector<8x128xi32>
      %66 = arith.addi %65, %63 : vector<8x128xi32>
      %c32_i32 = arith.constant 32 : i32
      %67 = vector.broadcast %c32_i32 : i32 to vector<8x128xi32>
      %68 = arith.cmpi slt, %66, %67 : vector<8x128xi32>
      %69 = arith.andi %53, %68 : vector<8x128xi1>
      %c0_40 = arith.constant 0 : index
      %c0_41 = arith.constant 0 : index
      %70 = vector.load %arg7[%c0_40, %c0_41] : memref<8x128xf32, #tpu.memory_space<vmem>>, vector<8x128xf32>
      %cst_42 = arith.constant 0.000000e+00 : f32
      %71 = vector.broadcast %cst_42 : f32 to vector<8x128xf32>
      %72 = arith.select %69, %51, %71 : vector<8x128xi1>, vector<8x128xf32>
      %73 = arith.addf %70, %72 : vector<8x128xf32>
      %c0_43 = arith.constant 0 : index
      %c0_44 = arith.constant 0 : index
      %74 = vector.load %arg7[%c0_43, %c0_44] : memref<8x128xf32, #tpu.memory_space<vmem>>, vector<8x128xf32>
      tpu.vector_store %arg7[%c0_43, %c0_44], %73 {strides = array<i32>} : memref<8x128xf32, #tpu.memory_space<vmem>>, vector<8x128xf32>,
      %c0_45 = arith.constant 0 : index
      %c0_46 = arith.constant 0 : index
      %75 = vector.load %arg8[%c0_45, %c0_46] : memref<8x128xf32, #tpu.memory_space<vmem>>, vector<8x128xf32>
      %76 = arith.extui %69 : vector<8x128xi1> to vector<8x128xi32>
      %77 = arith.sitofp %76 : vector<8x128xi32> to vector<8x128xf32>
      %78 = arith.addf %75, %77 : vector<8x128xf32>
      %c0_47 = arith.constant 0 : index
      %c0_48 = arith.constant 0 : index
      %79 = vector.load %arg8[%c0_47, %c0_48] : memref<8x128xf32, #tpu.memory_space<vmem>>, vector<8x128xf32>
      tpu.vector_store %arg8[%c0_47, %c0_48], %78 {strides = array<i32>} : memref<8x128xf32, #tpu.memory_space<vmem>>, vector<8x128xf32>,
    } else {
    }
    %c0_i32_38 = arith.constant 0 : i32
    %60 = arith.cmpi eq, %arg2, %c0_i32_38 : i32
    %61 = arith.extui %60 : i1 to i32
    %c0_i32_39 = arith.constant 0 : i32
    %62 = arith.cmpi ne, %61, %c0_i32_39 : i32
    scf.if %62 {
      %c0_40 = arith.constant 0 : index
      %c0_41 = arith.constant 0 : index
      %63 = vector.load %arg7[%c0_40, %c0_41] : memref<8x128xf32, #tpu.memory_space<vmem>>, vector<8x128xf32>
      %cst_42 = arith.constant dense<0.000000e+00> : vector<8xf32>
      %64 = vector.multi_reduction <add>, %63, %cst_42 [1] : vector<8x128xf32> to vector<8xf32>
      %65 = vector.shape_cast %64 : vector<8xf32> to vector<8x1xf32>
      %c0_43 = arith.constant 0 : index
      %c0_44 = arith.constant 0 : index
      %66 = vector.load %arg8[%c0_43, %c0_44] : memref<8x128xf32, #tpu.memory_space<vmem>>, vector<8x128xf32>
      %cst_45 = arith.constant dense<0.000000e+00> : vector<8xf32>
      %67 = vector.multi_reduction <add>, %66, %cst_45 [1] : vector<8x128xf32> to vector<8xf32>
      %68 = vector.shape_cast %67 : vector<8xf32> to vector<8x1xf32>
      %cst_46 = arith.constant dense<0.000000e+00> : vector<1xf32>
      %69 = vector.multi_reduction <add>, %65, %cst_46 [0] : vector<8x1xf32> to vector<1xf32>
      %70 = vector.shape_cast %69 : vector<1xf32> to vector<1x1xf32>
      %c0_47 = arith.constant 0 : index
      %c0_48 = arith.constant 0 : index
      %c0_49 = arith.constant 0 : index
      %71 = vector.load %arg5[%c0_47, %c0_48, %c0_49] : memref<1x1x1xf32, #tpu.memory_space<vmem>>, vector<1x1x1xf32>
      %72 = vector.shape_cast %71 : vector<1x1x1xf32> to vector<1x1xf32>
      %73 = vector.shape_cast %70 : vector<1x1xf32> to vector<1x1x1xf32>
      tpu.vector_store %arg5[%c0_47, %c0_48, %c0_49], %73 {strides = array<i32>} : memref<1x1x1xf32, #tpu.memory_space<vmem>>, vector<1x1x1xf32>,
      %cst_50 = arith.constant dense<0.000000e+00> : vector<1xf32>
      %74 = vector.multi_reduction <add>, %68, %cst_50 [0] : vector<8x1xf32> to vector<1xf32>
      %75 = vector.shape_cast %74 : vector<1xf32> to vector<1x1xf32>
      %c0_51 = arith.constant 0 : index
      %c0_52 = arith.constant 0 : index
      %c0_53 = arith.constant 0 : index
      %76 = vector.load %arg6[%c0_51, %c0_52, %c0_53] : memref<1x1x1xf32, #tpu.memory_space<vmem>>, vector<1x1x1xf32>
      %77 = vector.shape_cast %76 : vector<1x1x1xf32> to vector<1x1xf32>
      %78 = vector.shape_cast %75 : vector<1x1xf32> to vector<1x1x1xf32>
      tpu.vector_store %arg6[%c0_51, %c0_52, %c0_53], %78 {strides = array<i32>} : memref<1x1x1xf32, #tpu.memory_space<vmem>>, vector<1x1x1xf32>,
    } else {
    }
    return
  }
  func.func @transform_0(%arg0: i32, %arg1: i32, %arg2: i32) -> (i32, i32, i32, i32) {
    %c1_i32 = arith.constant 1 : i32
    %0 = arith.muli %arg1, %c1_i32 : i32
    %1 = arith.addi %0, %arg2 : i32
    %c0_i32 = arith.constant 0 : i32
    %c0_i32_0 = arith.constant 0 : i32
    %c0_i32_1 = arith.constant 0 : i32
    return %arg0, %c0_i32, %c0_i32_0, %1 : i32, i32, i32, i32
  }
  func.func @transform_1(%arg0: i32, %arg1: i32, %arg2: i32) -> (i32, i32, i32) {
    %c1_i32 = arith.constant 1 : i32
    %0 = arith.muli %arg1, %c1_i32 : i32
    %1 = arith.addi %0, %arg2 : i32
    %c0_i32 = arith.constant 0 : i32
    %c0_i32_0 = arith.constant 0 : i32
    return %arg0, %c0_i32, %1 : i32, i32, i32
  }
  func.func @transform_2(%arg0: i32, %arg1: i32, %arg2: i32) -> (i32, i32, i32) {
    %c1_i32 = arith.constant 1 : i32
    %0 = arith.muli %arg0, %c1_i32 : i32
    %1 = arith.addi %0, %arg1 : i32
    %c0_i32 = arith.constant 0 : i32
    %c0_i32_0 = arith.constant 0 : i32
    %c0_i32_1 = arith.constant 0 : i32
    return %1, %c0_i32, %c0_i32_0 : i32, i32, i32
  }
  func.func @transform_3(%arg0: i32, %arg1: i32, %arg2: i32) -> (i32, i32, i32) {
    %c1_i32 = arith.constant 1 : i32
    %0 = arith.muli %arg0, %c1_i32 : i32
    %1 = arith.addi %0, %arg1 : i32
    %c0_i32 = arith.constant 0 : i32
    %c0_i32_0 = arith.constant 0 : i32
    %c0_i32_1 = arith.constant 0 : i32
    return %1, %c0_i32, %c0_i32_0 : i32, i32, i32
  }
}

</mosaic_0001>

<bundles_post_ra>
// kernel: tpu_custom_call.1
= control target key start
LH: loop header
LB: loop body
LE: loop exit
PB: predicated region body
PF: predicated region fallthrough
CT: control target
= control target key end

     0   :  { %9 = vsyncpa [#allocation5], 0  ;;  %s908_s0 = inlined_call_operand.hbm [shape: f32[2,4,8,32], index: 0, kind: input, shape index: {}]   ;;  %s909_s1 = inlined_call_operand.hbm [shape: s32[2,8,32], index: 1, kind: input, shape index: {}]   ;;  %s910_s2 = inlined_call_operand.vmem [shape: f32[2,1,1], index: 2, kind: output, shape index: {0}]   ;;  %s911_s3 = inlined_call_operand.vmem [shape: f32[2,1,1], index: 3, kind: output, shape index: {1}]  }
   0x1   :  { %11 = vsyncpa [#allocation5 + $0x1], 0 }
   0x2   :  { %12 = vsyncpa [#allocation7], 0 }
   0x3   :  { %14 = vsyncpa [#allocation7 + $0x1], 0  ;;  %s741_s12 = smov 0   ;;  %s743_s13 = smov 0  }
   0x4   :  { %s745_s14 = smov 0   ;;  %s747_s15 = smov 0  }
   0x5   :  { %s749_s16 = smov 0   ;;  %s751_s17 = smov 0  }
   0x6 LB: > { %s507_s18 = sadd.s32 4294967295, %s714_s17   ;;  %s39_s19 = sadd.s32 1, %s710_s16  ;;  %s714_s17 = sphi %s751_s17, %s20_s17   ;;  %s710_s16 = sphi %s749_s16, %s923_s16   ;;  %s706_s15 = sphi %s747_s15, %s922_s15   ;;  %s702_s14 = sphi %s745_s14, %s921_s14   ;;  %s698_s13 = sphi %s743_s13, %s920_s13   ;;  %s694_s12 = sphi %s741_s12, %s919_s12  }
   0x7   : > { %p41_p0 = scmp.ge.s32.totalorder %s39_s19, 2  ;;  %s50_s20 = sadd.s32 1, %s702_s14 }
   0x8   : > { %p57_p1 = scmp.ne.s32.totalorder %s702_s14, %s698_s13  ;;  %p58_p2 = scmp.eq.s32.totalorder %s714_s17, 0 }
   0x9   : > { %s925_s19 = smov (%p41_p0, %s39_s19), 0  ;;  %p63_p4 = scmp.ne.s32.totalorder %s698_s13, %s694_s12 }
   0xa   : > { %p777_p3 = por %p58_p2, %p57_p1  ;;  %s45_s22 = ssub.s32 %s710_s16, %s925_s19 }
   0xb   : > { %p64_p5 = scmp.eq.s32.totalorder %s507_s18, 0  ;;  %p48_p6 = scmp.eq.s32.totalorder %s45_s22, 0 }
   0xc   : > { %p538_p8 = scmp.lt.s32.totalorder %s714_s17, 2  ;;  %s793_s25 = sand.u32 1, %s702_s14  }
   0xd   : > { %p784_p7 = por %p64_p5, %p63_p4  ;;  %s526_s26 = sshll.u32 %s710_s16, 9 }
   0xe   : > { %s790_s24 = scalar_select %p48_p6, %s702_s14, %s50_s20  }
   0xf   : > { %s914_s23 = scalar_select %p784_p7, 1, 0 }
  0x10   : > { %s511_s27 = sshll.u32 %s793_s25, 5  ;;  %s800_s30 = scalar_lea.hbm %s908_s0, %s526_s26 }
  0x11   : > { %s177_s4 = scalar_lea.vmem [#allocation4], %s511_s27  ;;  %p804_p9 = pnand %p538_p8, %p777_p3 }
  0x12   : > { %s186_s5 = sshll.u32 %s177_s4, 4  ;;  %s174_s7 = scalar_lea.sflag [#allocation5], %s793_s25  ;;  %s808_s5 = int_to_ptr.vmem [resolvable:$true] %s186_s5 }
  0x13   : > { %s600_s8 = scalar_lea.hbm %s800_s30, 512  ;;  %p602_p11 = pneg %p804_p9 }
  0x14   : > { %p601_p10 = scmp.ne.s32.totalorder %s800_s30, %s600_s8  ;;  %s605_s11 = scalar_lea.hbm %s908_s0, 1024 }
  0x15   : > { %p606_p0 = scmp.lt.u32.totalorder %s800_s30, %s908_s0  ;;  %p607_p1 = scmp.lt.u32.totalorder %s605_s11, %s600_s8 }
  0x16   : > { %p603_p12 = pnand %p602_p11, %p601_p10  ;;  %p609_p3 = scmp.lt.u32.totalorder %s600_s8, %s800_s30 }
  0x17   : > { %p608_p2 = por %p607_p1, %p606_p0 }
  0x18   : > { %p604_p13 = pneg %p603_p12 }
  0x19   : > { %p610_p4 = por %p609_p3, %p608_p2 }
  0x1b   : > { %p611_p5 = pnand %p610_p4, %p604_p13 }
  0x1d   : > { %614 = shalt.err (!%p611_p5)
}
  0x1e   : > { %s615_s20 = scalar_lea.vmem %s808_s5, 512  ;;  %s716_s21 = smov [#allocation4]  }
  0x1f   : > { %p616_p6 = scmp.ne.s32.totalorder %s808_s5, %s615_s20  ;;  %s620_s22 = sshll.u32 %s716_s21, 4  ;;  %s621_s22 = int_to_ptr.vmem [resolvable:$false] %s620_s22 }
  0x20   : > { %s622_s26 = scalar_lea.vmem %s621_s22, 1024  ;;  %p623_p12 = scmp.lt.s32.totalorder %s808_s5, %s621_s22 }
  0x21   : > { %p618_p8 = pnand %p616_p6, %p602_p11  ;;  %p624_p0 = scmp.lt.s32.totalorder %s622_s26, %s615_s20 }
  0x23   : > { %p619_p10 = pneg %p618_p8  ;;  %p625_p1 = por %p624_p0, %p623_p12 }
  0x25   : > { %p626_p2 = pnand %p625_p1, %p619_p10 }
  0x27   : > { %629 = shalt.err (!%p626_p2)
}
  0x28   : > { %s717_s27 = smov 128   ;;  %s718_s28 = smov 8  }
  0x29   : > { %534 = dma.hbm_to_vmem [thread:$0]  (!%p804_p9), %s800_s30, 512, %s808_s5, %s174_s7, %s717_s27, %s717_s27, %s718_s28  }
  0x2a   : > { %p516_p13 = scmp.ge.s32.totalorder %s714_s17, 1  ;;  %p214_p3 = scmp.lt.s32.totalorder %s714_s17, 3 }
  0x2b   : > { %s514_s29 = sshll.u32 %s793_s25, 3  ;;  %s515_s8 = sshll.u32 %s710_s16, 7 }
  0x2c   : > { %p841_p4 = pnand %p516_p13, %p214_p3  ;;  %s200_s9 = scalar_lea.vmem [#allocation6], %s514_s29 }
  0x2d   : > { %s209_s10 = sshll.u32 %s200_s9, 4  ;;  %s849_s18 = scalar_lea.hbm %s909_s1, %s515_s8  ;;  %s210_s10 = int_to_ptr.vmem [resolvable:$true] %s209_s10 }
  0x2e   : > { %s916_s4 = scalar_select %p841_p4, 1, 0 }
  0x2f   : > { %s197_s30 = scalar_lea.sflag [#allocation7], %s793_s25  ;;  %s630_s5 = scalar_lea.hbm %s849_s18, 128 }
  0x30   : > { %p631_p5 = scmp.ne.s32.totalorder %s849_s18, %s630_s5  ;;  %s635_s21 = scalar_lea.hbm %s909_s1, 256 }
  0x31   : > { %p636_p10 = scmp.lt.u32.totalorder %s849_s18, %s909_s1  ;;  %p637_p12 = scmp.lt.u32.totalorder %s635_s21, %s630_s5 }
  0x32   : > { %p633_p6 = pnand %p631_p5, %p602_p11  ;;  %p639_p1 = scmp.lt.u32.totalorder %s630_s5, %s849_s18 }
  0x33   : > { %p638_p0 = por %p637_p12, %p636_p10 }
  0x34   : > { %p634_p8 = pneg %p633_p6 }
  0x35   : > { %p640_p2 = por %p639_p1, %p638_p0 }
  0x37   : > { %p641_p13 = pnand %p640_p2, %p634_p8 }
  0x39   : > { %644 = shalt.err (!%p641_p13)
}
  0x3a   : > { %s645_s25 = scalar_lea.vmem %s210_s10, 128  ;;  %s719_s27 = smov [#allocation6]  }
  0x3b   : > { %p646_p3 = scmp.ne.s32.totalorder %s210_s10, %s645_s25  ;;  %s650_s28 = sshll.u32 %s719_s27, 4  ;;  %s651_s28 = int_to_ptr.vmem [resolvable:$false] %s650_s28 }
  0x3c   : > { %s652_s29 = scalar_lea.vmem %s651_s28, 256  ;;  %p653_p7 = scmp.lt.s32.totalorder %s210_s10, %s651_s28 }
  0x3d   : > { %p648_p5 = pnand %p646_p3, %p602_p11  ;;  %p654_p4 = scmp.lt.s32.totalorder %s652_s29, %s645_s25 }
  0x3f   : > { %p649_p6 = pneg %p648_p5  ;;  %p655_p10 = por %p654_p4, %p653_p7 }
  0x41   : > { %p656_p12 = pnand %p655_p10, %p649_p6 }
  0x43   : > { %659 = shalt.err (!%p656_p12)
}
  0x44   : > { %537 = dma.hbm_to_vmem [thread:$0]  (!%p804_p9), %s849_s18, 128, %s210_s10, %s197_s30  }
  0x45   : > { %p917_p8 = scmp.ne.s32.totalorder %s916_s4, 0 }
  0x46   : > { %s220_s8 = sand.u32 (!%p917_p8), 1, %s698_s13   ;;  %p918_p11 = scmp.ne.s32.totalorder (!%p917_p8), %s914_s23, 0 }
  0x47   : > { %218 = sbr.rel (%p917_p8) target bundleno = 286 (0x11e), region = 28  ;;  %s517_s9 = sshll.u32 (!%p917_p8), %s220_s8, 5 }
  0x48   : > { %s221_s11 = scalar_lea.sflag (!%p917_p8), [#allocation5], %s220_s8  ;;  %s224_s12 = scalar_lea.vmem (!%p917_p8), [#allocation4], %s517_s9 }
  0x4e   : > { %685 = dma.done.wait (%p918_p11), %s221_s11, 512  }
  0x4f   : > { %687 = vsyncadd (%p918_p11), %s221_s11, 4294966784  ;;  %s518_s5 = sshll.u32 %s220_s8, 3  ;;  %s230_s7 = scalar_lea.sflag [#allocation7], %s220_s8 }
  0x50   : > { %s233_s6 = scalar_lea.vmem [#allocation6], %s518_s5 }
  0x51   : > { %689 = dma.done.wait (%p918_p11), %s230_s7, 128  }
  0x52   : > { %691 = vsyncadd (%p918_p11), %s230_s7, 4294967168  ;;  %v284_v0 = vld [vmem:[%s224_s12] sm:$0xff]  ;;  %v519_v1 = vld [vmem:[%s224_s12 + $0x8] sm:$0xff]  ;;  %v338_v24 = vlaneseq  ;;  %v720_v33 = vmov 0.0   ;;  %p267_p7 = scmp.lt.s32.totalorder %s706_s15, 1  ;;  %vm369_vm7 = vcmask 0  }
  0x53   : > { %v287_v2 = vmax.f32 %v284_v0, %v519_v1  ;;  %v520_v3 = vld [vmem:[%s224_s12 + $0x10] sm:$0xff]  ;;  %v521_v4 = vld [vmem:[%s224_s12 + $0x18] sm:$0xff]  ;;  %v283_v20 = vld [vmem:[%s233_s6] sm:$0xff] }
  0x54   : > { %vm297_vm0 = vcmp.eq.s32.totalorder %v283_v20, 0  ;;  %vm303_vm1 = vcmp.eq.s32.totalorder %v283_v20, 1  ;;  %vm309_vm2 = vcmp.eq.s32.totalorder %v283_v20, 2  ;;  %v339_v26 = vand.u32 127, %v338_v24  ;;  %s927_s15 = smov (!%p267_p7, %s706_s15), 1 }
  0x55   : > { %v290_v5 = vmax.f32 %v287_v2, %v520_v3  ;;  %vm315_vm3 = vcmp.eq.s32.totalorder %v283_v20, 3  ;;  %vm320_vm4 = vcmp.ne.s32.totalorder %v283_v20, 4294967295  ;;  %s269_s10 = scalar_lea.vmem %s910_s2, %s927_s15  ;;  %s274_s20 = scalar_lea.vmem %s911_s3, %s927_s15 }
  0x56   : > { %vm343_vm5 = vcmp.lt.s32.totalorder %v339_v26, 32 }
  0x57   : > { %v293_v6 = vmax.f32 %v290_v5, %v521_v4  ;;  %vm344_vm6 = vmand %vm320_vm4, %vm343_vm5 }
  0x58   : > { %v523_v34 = vsel %vm344_vm6, 1.0, %v720_v33 }
  0x59   : > { %v294_v7 = vsub.f32 %v284_v0, %v293_v6  ;;  %v299_v8 = vsub.f32 %v519_v1, %v293_v6  ;;  %v305_v9 = vsub.f32 %v520_v3, %v293_v6  ;;  %v311_v10 = vsub.f32 %v521_v4, %v293_v6 }
  0x5b   : > { %v295_v11 = vmul.f32 1.442695, %v294_v7  ;;  %v300_v12 = vmul.f32 1.442695, %v299_v8  ;;  %v306_v13 = vmul.f32 1.442695, %v305_v9 }
  0x5c   : > { %v312_v14 = vmul.f32 1.442695, %v311_v10  ;;  %v298_v23 = vsel %vm297_vm0, %v294_v7, 0.0 }
  0x5d   : > { %590 = vpow2.f32 %v295_v11  ;;  %v304_v25 = vsel %vm303_vm1, %v299_v8, %v298_v23 }
  0x5e   : > { %592 = vpow2.f32 %v300_v12  ;;  %v310_v27 = vsel %vm309_vm2, %v305_v9, %v304_v25 }
  0x5f   : > { %594 = vpow2.f32 %v306_v13  ;;  %v316_v29 = vsel %vm315_vm3, %v311_v10, %v310_v27 }
  0x60   : > { %596 = vpow2.f32 %v312_v14 }
  0x67   : > { %v591_v15 = vpop.eup %590 }
  0x68   : > { %v593_v16 = vpop.eup %592 }
  0x69   : > { %v595_v17 = vpop.eup %594  ;;  %v302_v18 = vadd.f32 %v593_v16, %v591_v15 }
  0x6a   : > { %v597_v19 = vpop.eup %596 }
  0x6b   : > { %v308_v21 = vadd.f32 %v595_v17, %v302_v18 }
  0x6d   : > { %v314_v22 = vadd.f32 %v597_v19, %v308_v21 }
  0x6f   : > { %598 = vlog2.f32 %v314_v22 }
  0x79   : > { %v599_v28 = vpop.eup %598 }
  0x7a   : > { %v318_v30 = vmul.f32 0.6931472, %v599_v28 }
  0x7c   : > { %v319_v31 = vsub.f32 %v318_v30, %v316_v29 }
  0x7e   : > { %v346_v32 = vsel %vm344_vm6, %v319_v31, 0.0 }
  0x7f   : > { %358 = vadd.xlane.f32.xlu0 %v346_v32 }
  0x83   : > { %361 = vadd.xlane.f32.xlu0 %v523_v34 }
 0x10c   : > { %v359_v35 = vpop.xlane.xlu0 %358 }
 0x10d   : > { %v363_v36 = vrot.slane %v359_v35, 4 }
 0x10f   : > { %v364_v37 = vadd.f32 %v363_v36, %v359_v35 }
 0x110   : > { %v362_v38 = vpop.xlane.xlu0 %361 }
 0x111   : > { %v365_v39 = vrot.slane %v364_v37, 2  ;;  %v371_v40 = vrot.slane %v362_v38, 4 }
 0x113   : > { %v366_v41 = vadd.f32 %v365_v39, %v364_v37  ;;  %v372_v42 = vadd.f32 %v371_v40, %v362_v38 }
 0x115   : > { %v367_v43 = vrot.slane %v366_v41, 1  ;;  %v373_v44 = vrot.slane %v372_v42, 2 }
 0x117   : > { %v368_v45 = vadd.f32 %v367_v43, %v366_v41  ;;  %v374_v46 = vadd.f32 %v373_v44, %v372_v42 }
 0x119   : > { %370 = vst.msk [vmem:[%s269_s10] sm:$0x1] %vm369_vm7, %v368_v45  ;;  %v375_v47 = vrot.slane %v374_v46, 1 }
 0x11b   : > { %v376_v48 = vadd.f32 %v375_v47, %v374_v46 }
 0x11d   : > { %377 = vst.msk [vmem:[%s274_s20] sm:$0x1] %vm369_vm7, %v376_v48 }
 0x11e PF: > { %s20_s17 = sadd.s32 1, %s714_s17   ;;  %s919_s12 = smov %s698_s13 }
 0x11f   : > { %p17_p9 = scmp.ge.s32.totalorder %s20_s17, 4   ;;  %s920_s13 = smov %s702_s14 }
 0x120   : > { %s921_s14 = smov %s790_s24  ;;  %s922_s15 = smov %s710_s16 }
 0x121   : > { %s923_s16 = smov %s925_s19  ;;  %19 = sbr.rel (!%p17_p9) target bundleno = 6 (0x6), region = 112 }
 0x128   :  { %413 = vsyncpa [#allocation5], 1 }
 0x129   :  { %415 = vsyncpa [#allocation5 + $0x1], 1 }
 0x12a   :  { %416 = vsyncpa [#allocation7], 1 }
 0x12b   :  { %418 = vsyncpa [#allocation7 + $0x1], 1 }

</bundles_post_ra>
